<compile_context>
chip_gen: v6e
topology: v6e:2x2x1
jax: 0.10.0
libtpu: 0.0.40
codegen_flags: <defaults>
</compile_context>

<pallas_src>
import jax
import jax.numpy as jnp
from jax.experimental import pallas as pl
from jax.experimental.pallas import tpu as pltpu


def _round_up(v, m):
    return (v + m - 1) // m * m


# ---------------------------------------------------------------------------
# Kernels
# ---------------------------------------------------------------------------

def _resident_kernel(x_ref, w_ref, b_ref, o_ref):
    """W fully resident in VMEM; one (tm, H_out_p) output tile per grid step."""
    acc = jnp.dot(x_ref[...], w_ref[...], preferred_element_type=jnp.float32)
    o_ref[...] = (acc + b_ref[...]).astype(o_ref.dtype)


def _streamed_kernel_f32(x_ref, w_ref, b_ref, o_ref):
    """f32 output: accumulate directly into the K-resident output block."""
    k = pl.program_id(2)

    @pl.when(k == 0)
    def _():
        o_ref[...] = jnp.broadcast_to(b_ref[...], o_ref.shape)

    o_ref[...] += jnp.dot(x_ref[...], w_ref[...],
                          preferred_element_type=jnp.float32)


def _streamed_kernel_acc(x_ref, w_ref, b_ref, o_ref, acc_ref):
    """Non-f32 output: f32 scratch accumulator, cast on the last K step."""
    k = pl.program_id(2)

    @pl.when(k == 0)
    def _():
        acc_ref[...] = jnp.zeros_like(acc_ref)

    acc_ref[...] += jnp.dot(x_ref[...], w_ref[...],
                            preferred_element_type=jnp.float32)

    @pl.when(k == pl.num_programs(2) - 1)
    def _():
        o_ref[...] = (acc_ref[...] + b_ref[...]).astype(o_ref.dtype)


# ---------------------------------------------------------------------------
# Wrapper (the SequenceWise forward)
# ---------------------------------------------------------------------------

def sequence_wise_linear(x, w, b, *, tm=512, tn=512, tk=512,
                         compute_dtype=None, w_resident_bytes=10 << 20,
                         vmem_limit_bytes=48 << 20, use_pallas=None):
    """SequenceWise(nn.Linear) forward.

    x: (T, N, H_in); w: (H_in, H_out) (pre-transposed vs. PyTorch's
    (H_out, H_in) storage); b: (H_out,).  Returns (T, N, H_out) in x.dtype.
    """
    t, n = x.shape[0], x.shape[1]
    x2 = x.reshape(t * n, -1)            # the SequenceWise collapse (view/glue)
    m, h_in = x2.shape
    h_out = w.shape[1]
    out_dtype = x.dtype

    # Tiny problems do not amortize kernel grid-step overhead (~0.35 us/step).
    if use_pallas is None:
        use_pallas = (2 * m * h_in * h_out) >= (1 << 22)
    if not use_pallas:
        return (x2 @ w + b).astype(out_dtype).reshape(t, n, h_out)

    cdt = jnp.dtype(compute_dtype) if compute_dtype is not None else jnp.dtype(x.dtype)
    c_isz = cdt.itemsize
    o_isz = jnp.dtype(out_dtype).itemsize

    x2c = x2.astype(cdt)
    wc = w.astype(cdt)

    flops = int(2 * m * h_in * h_out)
    h_out_128 = _round_up(h_out, 128)     # lane-dense output columns
    resident = (h_in * h_out_128 * c_isz) <= w_resident_bytes

    if resident:
        # ---- Resident-W path: weight DMA'd once (constant block index). ----
        h_out_p = h_out_128
        w_p = wc
        if h_out_p != h_out:
            w_p = jnp.pad(wc, ((0, 0), (0, h_out_p - h_out)))
        b_p = b.reshape(1, h_out).astype(jnp.float32)
        if h_out_p != h_out:
            b_p = jnp.pad(b_p, ((0, 0), (0, h_out_p - h_out)))

        w_bytes = h_in * h_out_p * c_isz
        tm_eff = _round_up(min(tm, _round_up(m, 8)), 8)
        # Keep double-buffered x/out tiles + (possibly double-buffered) W
        # under a conservative budget below vmem_limit_bytes (v7x: 64 MiB phys).
        budget = min(vmem_limit_bytes, 48 << 20) - (8 << 20)
        while tm_eff > 8 and (2 * tm_eff * (h_in * c_isz + h_out_p * o_isz)
                              + 2 * w_bytes) > budget:
            tm_eff = max(8, _round_up(tm_eff // 2, 8))
        m_tiles = pl.cdiv(m, tm_eff)

        cost = pl.CostEstimate(
            flops=flops, transcendentals=0,
            bytes_accessed=int(m * h_in * c_isz + w_bytes
                               + h_out_p * 4 + m * h_out_p * o_isz))

        out_p = pl.pallas_call(
            _resident_kernel,
            out_shape=jax.ShapeDtypeStruct((m, h_out_p), out_dtype),
            grid=(m_tiles,),
            in_specs=[
                pl.BlockSpec((tm_eff, h_in), lambda i: (i, 0)),      # x tile
                pl.BlockSpec((h_in, h_out_p), lambda i: (0, 0)),     # W resident
                pl.BlockSpec((1, h_out_p), lambda i: (0, 0)),        # bias
            ],
            out_specs=pl.BlockSpec((tm_eff, h_out_p), lambda i: (i, 0)),
            compiler_params=pltpu.CompilerParams(
                dimension_semantics=("parallel",),
                vmem_limit_bytes=vmem_limit_bytes,
            ),
            cost_estimate=cost,
        )(x2c, w_p, b_p)

    else:
        # ---- Streamed path: tile M, H_out (N) and H_in (K); K last. ----
        tn_eff = min(tn, h_out_128)                  # multiple of 128
        n_tiles = pl.cdiv(h_out, tn_eff)
        h_out_p = n_tiles * tn_eff

        if h_in <= tk:
            tk_eff, k_tiles, h_in_p = h_in, 1, h_in  # full-dim K block, no pad
        else:
            tk_eff = tk                              # multiple of 128
            k_tiles = pl.cdiv(h_in, tk_eff)
            h_in_p = k_tiles * tk_eff                # zero-pad: exact for matmul

        tm_eff = _round_up(min(tm, _round_up(m, 8)), 8)
        m_tiles = pl.cdiv(m, tm_eff)                 # ragged last tile OK

        x_p = x2c
        if h_in_p != h_in:
            x_p = jnp.pad(x2c, ((0, 0), (0, h_in_p - h_in)))
        w_p = wc
        if (h_in_p, h_out_p) != (h_in, h_out):
            w_p = jnp.pad(wc, ((0, h_in_p - h_in), (0, h_out_p - h_out)))
        b_p = b.reshape(1, h_out).astype(jnp.float32)
        if h_out_p != h_out:
            b_p = jnp.pad(b_p, ((0, 0), (0, h_out_p - h_out)))

        cost = pl.CostEstimate(
            flops=flops, transcendentals=0,
            bytes_accessed=int(
                n_tiles * m_tiles * tm_eff * h_in_p * c_isz   # x re-read per N tile
                + m_tiles * h_in_p * h_out_p * c_isz          # W re-streamed per M tile
                + m * h_out_p * o_isz                         # output written once
                + h_out_p * 4))

        if jnp.dtype(out_dtype) == jnp.float32:
            kernel = _streamed_kernel_f32
            scratch = []
        else:
            kernel = _streamed_kernel_acc
            scratch = [pltpu.VMEM((tm_eff, tn_eff), jnp.float32)]

        out_p = pl.pallas_call(
            kernel,
            out_shape=jax.ShapeDtypeStruct((m, h_out_p), out_dtype),
            grid=(m_tiles, n_tiles, k_tiles),                 # reduction (K) last
            in_specs=[
                pl.BlockSpec((tm_eff, tk_eff), lambda i, j, k: (i, k)),   # x
                pl.BlockSpec((tk_eff, tn_eff), lambda i, j, k: (k, j)),   # W
                pl.BlockSpec((1, tn_eff), lambda i, j, k: (0, j)),        # bias
            ],
            out_specs=pl.BlockSpec((tm_eff, tn_eff), lambda i, j, k: (i, j)),
            scratch_shapes=scratch,
            compiler_params=pltpu.CompilerParams(
                dimension_semantics=("parallel", "parallel", "arbitrary"),
                vmem_limit_bytes=vmem_limit_bytes,
            ),
            cost_estimate=cost,
        )(x_p, w_p, b_p)

    out2 = out_p[:, :h_out] if out_p.shape[1] != h_out else out_p
    return out2.reshape(t, n, h_out)


if __name__ == "__main__":
    key = jax.random.PRNGKey(0)
    ks = jax.random.split(key, 12)

    # Case 1: small shape matching the module's intended use; resident-W path.
    T, N, H_IN, H_OUT = 8, 2, 32, 32
    x = jax.random.normal(ks[0], (T, N, H_IN), dtype=jnp.float32)
    # PyTorch stores W as (H_OUT, H_IN); we keep the pre-transposed layout.
    w = jax.random.normal(ks[1], (H_IN, H_OUT), dtype=jnp.float32) * 0.1
    b = jax.random.normal(ks[2], (H_OUT,), dtype=jnp.float32) * 0.1
    y = jax.block_until_ready(sequence_wise_linear(x, w, b, use_pallas=True))
    ref = (x.reshape(T * N, H_IN) @ w + b).reshape(T, N, H_OUT)
    assert y.shape == (T, N, H_OUT)
    assert jnp.allclose(y, ref, atol=1e-4, rtol=1e-4)

    # Case 2: resident path with several M tiles and H_out lane padding.
    T2, N2, H_IN2, H_OUT2 = 64, 8, 256, 192           # m = 512
    x2 = jax.random.normal(ks[3], (T2, N2, H_IN2), dtype=jnp.float32)
    w2 = jax.random.normal(ks[4], (H_IN2, H_OUT2), dtype=jnp.float32) * 0.05
    b2 = jax.random.normal(ks[5], (H_OUT2,), dtype=jnp.float32) * 0.05
    y2 = jax.block_until_ready(
        sequence_wise_linear(x2, w2, b2, use_pallas=True, tm=128))
    ref2 = (x2.reshape(T2 * N2, H_IN2) @ w2 + b2).reshape(T2, N2, H_OUT2)
    assert y2.shape == (T2, N2, H_OUT2)
    assert jnp.allclose(y2, ref2, atol=1e-3, rtol=1e-3)

    # Case 3: streamed path (forced): ragged last M tile, K padding, multiple
    # H_out tiles, f32 accumulate-into-output kernel.
    T3, N3, H_IN3, H_OUT3 = 40, 16, 384, 320          # m = 640
    x3 = jax.random.normal(ks[6], (T3, N3, H_IN3), dtype=jnp.float32)
    w3 = jax.random.normal(ks[7], (H_IN3, H_OUT3), dtype=jnp.float32) * 0.05
    b3 = jax.random.normal(ks[8], (H_OUT3,), dtype=jnp.float32) * 0.05
    y3 = jax.block_until_ready(
        sequence_wise_linear(x3, w3, b3, use_pallas=True,
                             w_resident_bytes=0, tm=256, tn=256, tk=256))
    ref3 = (x3.reshape(T3 * N3, H_IN3) @ w3 + b3).reshape(T3, N3, H_OUT3)
    assert y3.shape == (T3, N3, H_OUT3)
    assert jnp.allclose(y3, ref3, atol=1e-3, rtol=1e-3)

    # Case 4: streamed path with bf16 I/O (f32 scratch-accumulator kernel).
    T4, N4, H_IN4, H_OUT4 = 16, 16, 256, 256          # m = 256
    x4 = jax.random.normal(ks[9], (T4, N4, H_IN4),
                           dtype=jnp.float32).astype(jnp.bfloat16)
    w4 = (jax.random.normal(ks[10], (H_IN4, H_OUT4), dtype=jnp.float32)
          * 0.05).astype(jnp.bfloat16)
    b4 = (jax.random.normal(ks[11], (H_OUT4,), dtype=jnp.float32)
          * 0.05).astype(jnp.bfloat16)
    y4 = jax.block_until_ready(
        sequence_wise_linear(x4, w4, b4, use_pallas=True,
                             w_resident_bytes=0, tm=128, tn=128, tk=128))
    ref4 = (x4.astype(jnp.float32).reshape(T4 * N4, H_IN4)
            @ w4.astype(jnp.float32)
            + b4.astype(jnp.float32)).reshape(T4, N4, H_OUT4)
    assert y4.shape == (T4, N4, H_OUT4)
    assert jnp.allclose(y4.astype(jnp.float32), ref4, atol=5e-2, rtol=5e-2)

    print("KERNEL_OK")
</pallas_src>

<mosaic_0001>
module attributes {stable_mosaic.version = 11 : i64} {
  func.func @_resident_kernel(%arg0: i32, %arg1: memref<16x32xf32, #tpu.memory_space<vmem>>, %arg2: memref<32x128xf32, #tpu.memory_space<vmem>>, %arg3: memref<1x128xf32, #tpu.memory_space<vmem>>, %arg4: memref<16x128xf32, #tpu.memory_space<vmem>>) attributes {dimension_semantics = [#tpu.dimension_semantics<parallel>], iteration_bounds = array<i64: 1>, scalar_prefetch = 0 : i64, scratch_operands = 0 : i64, tpu.core_type = #tpu.core_type<tc>, window_params = [{transform_indices = @transform_0, window_bounds = array<i64: 16, 32>}, {pipeline_mode = #tpu.pipeline_mode<synchronous>, transform_indices = @transform_1, window_bounds = array<i64: 32, 128>}, {pipeline_mode = #tpu.pipeline_mode<synchronous>, transform_indices = @transform_2, window_bounds = array<i64: 1, 128>}, {transform_indices = @transform_3, window_bounds = array<i64: 16, 128>}]} {
    %c0 = arith.constant 0 : index
    %c0_0 = arith.constant 0 : index
    %0 = vector.load %arg1[%c0, %c0_0] : memref<16x32xf32, #tpu.memory_space<vmem>>, vector<16x32xf32>
    %c0_1 = arith.constant 0 : index
    %c0_2 = arith.constant 0 : index
    %1 = vector.load %arg2[%c0_1, %c0_2] : memref<32x128xf32, #tpu.memory_space<vmem>>, vector<32x128xf32>
    %cst = arith.constant dense<0.000000e+00> : vector<16x128xf32>
    %2 = tpu.matmul %0, %1, %cst {dimension_numbers = #tpu.dot_dimension_numbers<[1], [0], [0], [1], [0, 0, 1, 1], [], []>} : vector<16x32xf32>, vector<32x128xf32>, vector<16x128xf32> -> vector<16x128xf32>
    %c0_3 = arith.constant 0 : index
    %c0_4 = arith.constant 0 : index
    %3 = vector.load %arg3[%c0_3, %c0_4] : memref<1x128xf32, #tpu.memory_space<vmem>>, vector<1x128xf32>
    %4 = vector.broadcast %3 : vector<1x128xf32> to vector<16x128xf32>
    %5 = arith.addf %2, %4 : vector<16x128xf32>
    %c0_5 = arith.constant 0 : index
    %c0_6 = arith.constant 0 : index
    %6 = vector.load %arg4[%c0_5, %c0_6] : memref<16x128xf32, #tpu.memory_space<vmem>>, vector<16x128xf32>
    tpu.vector_store %arg4[%c0_5, %c0_6], %5 {strides = array<i32>} : memref<16x128xf32, #tpu.memory_space<vmem>>, vector<16x128xf32>,
    return
  }
  func.func @transform_0(%arg0: i32) -> (i32, i32) {
    %c0_i32 = arith.constant 0 : i32
    %c0_i32_0 = arith.constant 0 : i32
    return %arg0, %c0_i32 : i32, i32
  }
  func.func @transform_1(%arg0: i32) -> (i32, i32) {
    %c0_i32 = arith.constant 0 : i32
    %c0_i32_0 = arith.constant 0 : i32
    %c0_i32_1 = arith.constant 0 : i32
    return %c0_i32, %c0_i32_0 : i32, i32
  }
  func.func @transform_2(%arg0: i32) -> (i32, i32) {
    %c0_i32 = arith.constant 0 : i32
    %c0_i32_0 = arith.constant 0 : i32
    %c0_i32_1 = arith.constant 0 : i32
    return %c0_i32, %c0_i32_0 : i32, i32
  }
  func.func @transform_3(%arg0: i32) -> (i32, i32) {
    %c0_i32 = arith.constant 0 : i32
    %c0_i32_0 = arith.constant 0 : i32
    return %arg0, %c0_i32 : i32, i32
  }
}

</mosaic_0001>

<bundles_post_ra>
// kernel: tpu_custom_call.1
= control target key start
LH: loop header
LB: loop body
LE: loop exit
PB: predicated region body
PF: predicated region fallthrough
CT: control target
= control target key end

     0   :  { %8 = vsyncpa [#allocation3], 0  ;;  %s297_s0 = inlined_call_operand.hbm [shape: f32[16,32], index: 0, kind: input, shape index: {}]   ;;  %s298_s1 = inlined_call_operand.hbm [shape: f32[32,128], index: 1, kind: input, shape index: {}]   ;;  %s299_s2 = inlined_call_operand.vmem [shape: f32[1,128], index: 2, kind: input, shape index: {}]   ;;  %s300_s3 = inlined_call_operand.hbm [shape: f32[16,128], index: 3, kind: output, shape index: {}]  }
   0x1   :  { %9 = vsyncpa [#allocation6], 0 }
   0x2   :  { %10 = vsyncpa [#allocation4], 0  ;;  %s249_s12 = smov [#allocation2]  }
   0x3   :  { %s16_s13 = sshll.u32 %s249_s12, 4  ;;  %s17_s13 = int_to_ptr.vmem [resolvable:$true] %s16_s13 }
   0x4   :  { %s191_s14 = scalar_lea.vmem %s17_s13, 256  ;;  %p196_p1 = scmp.lt.s32.totalorder %s17_s13, %s17_s13 }
   0x5   :  { %p192_p0 = scmp.ne.s32.totalorder %s17_s13, %s191_s14  ;;  %p197_p2 = scmp.lt.s32.totalorder %s191_s14, %s191_s14 }
   0x7   :  { %p198_p3 = por %p197_p2, %p196_p1 }
   0x9   :  { %p199_p4 = pnand %p198_p3, %p192_p0 }
   0xb   :  { %202 = shalt.err (!%p199_p4)
}
   0xc   :  { %s250_s15 = smov 128   ;;  %s251_s16 = smov 8  }
   0xd   :  { %22 = dma.hbm_to_vmem [thread:$0]  %s297_s0, 256, %s17_s13, [#allocation3], %s250_s15, %s250_s15, %s251_s16  }
   0xe   :  { %s252_s19 = smov [#allocation5]  }
   0xf   :  { %s28_s20 = sshll.u32 %s252_s19, 4  ;;  %s29_s20 = int_to_ptr.vmem [resolvable:$true] %s28_s20 }
  0x10   :  { %s211_s21 = scalar_lea.vmem %s29_s20, 512  ;;  %p216_p6 = scmp.lt.s32.totalorder %s29_s20, %s29_s20 }
  0x11   :  { %p212_p5 = scmp.ne.s32.totalorder %s29_s20, %s211_s21  ;;  %p217_p7 = scmp.lt.s32.totalorder %s211_s21, %s211_s21 }
  0x13   :  { %p218_p8 = por %p217_p7, %p216_p6 }
  0x15   :  { %p219_p9 = pnand %p218_p8, %p212_p5 }
  0x17   :  { %222 = shalt.err (!%p219_p9)
}
  0x18   :  { %34 = dma.hbm_to_vmem [thread:$0]  %s298_s1, 512, %s29_s20, [#allocation6], %s250_s15, %s250_s15, %s251_s16  }
  0x19   :  { %243 = dma.done.wait [#allocation3], 256  }
  0x1a   :  { %244 = vsyncadd [#allocation3], 4294967040 }
  0x1b   :  { %245 = dma.done.wait [#allocation6], 512  }
  0x1c   :  { %246 = vsyncadd [#allocation6], 4294966784  ;;  %vm56_vm0 = vcmask 261120   ;;  %v48_v0 = vld [vmem:[#allocation5 + $0x18] sm:$0xff]  ;;  %v47_v1 = vld [vmem:[#allocation5 + $0x10] sm:$0xff]  ;;  %s253_s24 = smov [#allocation7]  }
  0x1d   :  { %167 = vmatprep.subr.mxu0 %v48_v0  ;;  %v43_v2 = vld [vmem:[#allocation2] sm:$0xff]  ;;  %v46_v3 = vld [vmem:[#allocation5 + $0x8] sm:$0xff]  ;;  %v45_v4 = vld [vmem:[#allocation5] sm:$0xff]  ;;  %s145_s25 = sshll.u32 %s253_s24, 4  ;;  %s146_s25 = int_to_ptr.vmem [resolvable:$true] %s145_s25 }
  0x1e   :  { %168 = vmatpush3.msra.mxu0 %v48_v0  ;;  %175 = vmatprep.mubr.msk.f32.mxu0 %vm56_vm0, %v43_v2  ;;  %v44_v5 = vld [vmem:[#allocation2 + $0x8] sm:$0xff]  ;;  %v158_v6 = vld [vmem:[%s299_s2] ss:$0 sm:$0xff]  ;;  %s223_s26 = scalar_lea.vmem %s146_s25, 256  ;;  %p228_p11 = scmp.lt.s32.totalorder %s146_s25, %s146_s25 }
  0x1f   :  { %169 = vmatprep.subr.mxu0 %v47_v1  ;;  %p224_p10 = scmp.ne.s32.totalorder %s146_s25, %s223_s26  ;;  %p229_p12 = scmp.lt.s32.totalorder %s223_s26, %s223_s26 }
  0x20   :  { %170 = vmatpush3.msra.mxu0 %v47_v1 }
  0x21   :  { %171 = vmatprep.subr.mxu0 %v46_v3  ;;  %p230_p13 = por %p229_p12, %p228_p11 }
  0x22   :  { %172 = vmatpush3.msra.mxu0 %v46_v3 }
  0x23   :  { %173 = vmatprep.subr.mxu0 %v45_v4  ;;  %p231_p0 = pnand %p230_p13, %p224_p10 }
  0x24   :  { %174 = vmatpush3.msra.mxu0 %v45_v4 }
  0x25   :  { %176 = vmatmul.mubr.msk.f32.vlgmr.msra.gmra.mxu0 %vm56_vm0, %v44_v5 }
  0xe5   :  { %v177_v7 = vpop.f32.mrf.mxu0 }
  0xe6   :  { %v135_v8 = vadd.f32 %v177_v7, %v158_v6 }
  0xe7   :  { %v129_v9 = vpop.f32.mrf.mxu0 }
  0xe8   :  { %139 = vst [vmem:[#allocation7 + $0x8] sm:$0xff] %v135_v8  ;;  %v130_v10 = vadd.f32 %v158_v6, %v129_v9 }
  0xea   :  { %138 = vst [vmem:[#allocation7] sm:$0xff] %v130_v10 }
  0xeb   :  { %234 = shalt.err (!%p231_p0)
}
  0xec   :  { %151 = dma.vmem_to_hbm [thread:$0]  %s146_s25, 256, %s300_s3, [#allocation4], %s250_s15, %s250_s15, %s251_s16  }
  0xed   :  { %247 = dma.done.wait [#allocation4], 256  }
  0xee   :  { %248 = vsyncadd [#allocation4], 4294967040 }
  0xef   :  { %155 = vsyncpa [#allocation3], 1 }
  0xf0   :  { %156 = vsyncpa [#allocation6], 1 }
  0xf1   :  { %157 = vsyncpa [#allocation4], 1 }

</bundles_post_ra>
